<compile_context>
chip_gen: v6e
topology: v6e:2x2x1
jax: 0.10.0
libtpu: 0.0.40
codegen_flags: <defaults>
</compile_context>

<pallas_src>
from functools import partial

import numpy as np
import jax
import jax.numpy as jnp
from jax.experimental import pallas as pl
from jax.experimental.pallas import tpu as pltpu

NUM_JOINTS = 16
_EPS = 1e-8                      # torch.nn.CosineSimilarity default eps
_PRECISION = jax.lax.Precision.HIGHEST


def get_kinematic_parents(joint_preset=None):
    # Deterministic synthetic humanoid-like kinematic tree (root's parent = itself).
    return [0, 0, 1, 2, 3, 1, 5, 6, 1, 8, 9, 0, 11, 12, 0, 14]


def _round_up(x, m):
    return ((x + m - 1) // m) * m


def _build_constant_matrices(kinematic_parents, num_joints):
    """D: (3J,3J) pose_flat @ D -> bone_flat.  G_blk: (9J,3J) block-diag grouping."""
    J = num_joints
    JF = 3 * J
    D = np.zeros((JF, JF), np.float32)
    G = np.zeros((3 * JF, 3 * J), np.float32)
    for j in range(J):
        p = int(kinematic_parents[j])
        for c in range(3):
            o = 3 * j + c
            D[o, o] += 1.0
            D[3 * p + c, o] -= 1.0          # root: column all-zero -> bone 0 == 0
            G[o, j] = 1.0                   # pb*gb rows  -> dot   (cols 0..J-1)
            G[JF + o, J + j] = 1.0          # pb*pb rows  -> sq_p  (cols J..2J-1)
            G[2 * JF + o, 2 * J + j] = 1.0  # gb*gb rows  -> sq_g  (cols 2J..3J-1)
    return D, G


def _make_kernel(J, TB, B_eff, needs_mask):
    JF = 3 * J
    EPS2 = _EPS * _EPS

    def kernel(pred_ref, gt_ref, d_ref, g_ref, out_ref):
        D = d_ref[...]        # (JF, JF)
        Gb = g_ref[...]       # (3*JF, 3*J)

        # Bone vectors on the MXU (root bone column of D is zero -> bone 0 == 0).
        pb = jnp.dot(pred_ref[...], D, precision=_PRECISION,
                     preferred_element_type=jnp.float32)           # (TB, JF)
        gb = jnp.dot(gt_ref[...], D, precision=_PRECISION,
                     preferred_element_type=jnp.float32)           # (TB, JF)

        # One fused block-diagonal grouping matmul:
        #   [pb*gb | pb*pb | gb*gb] (TB, 3*JF) @ G_blk (3*JF, 3*J) -> (TB, 3*J)
        prods = jnp.concatenate([pb * gb, pb * pb, gb * gb], axis=1)
        grouped = jnp.dot(prods, Gb, precision=_PRECISION,
                          preferred_element_type=jnp.float32)      # (TB, 3*J)
        dotv = grouped[:, :J]
        sq_p = grouped[:, J:2 * J]
        sq_g = grouped[:, 2 * J:3 * J]

        # sqrt-free cosine + bone-length terms (single EUP rsqrt, no div/sqrt).
        prod = sq_p * sq_g
        r = jax.lax.rsqrt(jnp.maximum(prod, EPS2))   # 1 / max(|p|*|g|, eps)
        cos = dotv * r                               # cosine similarity
        # (|p|-|g|)^2 = sq_p + sq_g - 2*|p||g|,  |p||g| == prod * r (prod >= eps^2)
        diff2 = sq_p + sq_g - 2.0 * (prod * r)

        if needs_mask:
            # Ragged last tile: rows past B_eff hold undefined data -> select 0.
            row = jax.lax.broadcasted_iota(jnp.int32, (TB, J), 0)
            valid = row < (B_eff - pl.program_id(0) * TB)
            cos = jnp.where(valid, cos, 0.0)
            diff2 = jnp.where(valid, diff2, 0.0)

        # Batch-dimension reduction on the MXU (ones-row matmul); leave a tiny
        # (2, J) per-tile partial for the wrapper to reduce.
        ones_rows = jnp.ones((8, TB), jnp.float32)
        cos_part = jnp.dot(ones_rows, cos, precision=_PRECISION,
                           preferred_element_type=jnp.float32)     # (8, J) identical rows
        len_part = jnp.dot(ones_rows, diff2, precision=_PRECISION,
                           preferred_element_type=jnp.float32)
        out_ref[0, :, :] = jnp.concatenate(
            [cos_part[0:1, :], len_part[0:1, :]], axis=0)          # (2, J)

    return kernel


@partial(jax.jit, static_argnames=("kinematic_parents",))
def _loss_func_limb_jit(pose_predicted, pose_gt, kinematic_parents):
    B, J, C = pose_predicted.shape
    assert C == 3
    JF = 3 * J

    D_np, G_np = _build_constant_matrices(kinematic_parents, J)

    pred = pose_predicted.astype(jnp.float32).reshape(B, JF)
    gt = pose_gt.astype(jnp.float32).reshape(B, JF)

    # Pad only when B < one sublane tile (8 rows); zero rows contribute exactly 0.
    B_eff = B
    if B < 8:
        pad = jnp.zeros((8 - B, JF), jnp.float32)
        pred = jnp.concatenate([pred, pad], axis=0)
        gt = jnp.concatenate([gt, pad], axis=0)
        B_eff = 8

    # Batch tile: big enough to amortize per-step overhead, >=2 tiles for large
    # batches so both v7x TensorCores participate, never larger than the array.
    TB_MAX = 4096
    if B_eff >= 1024:
        TB = min(TB_MAX, _round_up(-(-B_eff // 2), 8))
    else:
        TB = min(TB_MAX, _round_up(B_eff, 8))
    TB = max(8, min(TB, (B_eff // 8) * 8))
    num_tiles = -(-B_eff // TB)
    needs_mask = (B_eff % TB) != 0

    kernel = _make_kernel(J, TB, B_eff, needs_mask)

    partials = pl.pallas_call(
        kernel,
        out_shape=jax.ShapeDtypeStruct((num_tiles, 2, J), jnp.float32),
        grid=(num_tiles,),
        in_specs=[
            pl.BlockSpec((TB, JF), lambda i: (i, 0)),        # predicted poses
            pl.BlockSpec((TB, JF), lambda i: (i, 0)),        # gt poses
            pl.BlockSpec((JF, JF), lambda i: (0, 0)),        # D (resident)
            pl.BlockSpec((3 * JF, 3 * J), lambda i: (0, 0)), # block-diag G (resident)
        ],
        out_specs=pl.BlockSpec((1, 2, J), lambda i: (i, 0, 0)),
        compiler_params=pltpu.CompilerParams(
            dimension_semantics=("parallel",),               # both TCs on v7x
            vmem_limit_bytes=48 * 1024 * 1024,
        ),
    )(pred, gt, jnp.asarray(D_np), jnp.asarray(G_np))

    cos_loss = jnp.sum(partials[:, 0, :]) / B
    bone_length_loss = jnp.sum(partials[:, 1, :]) / B
    return cos_loss, bone_length_loss


def loss_func_limb(pose_predicted, pose_gt, kinematic_parents):
    """Pallas implementation of LossFuncLimb.forward -> (cos_loss, bone_length_loss)."""
    return _loss_func_limb_jit(pose_predicted, pose_gt,
                               tuple(int(p) for p in kinematic_parents))


def _reference(pose_predicted, pose_gt, kinematic_parents):
    # pure-JAX reference matching the PyTorch forward
    parents = jnp.asarray(kinematic_parents, dtype=jnp.int32)
    pb = (pose_predicted - pose_predicted[..., parents, :])[..., 1:, :]
    gb = (pose_gt - pose_gt[..., parents, :])[..., 1:, :]
    dot = jnp.sum(pb * gb, axis=-1)
    np_ = jnp.linalg.norm(pb, axis=-1)
    ng = jnp.linalg.norm(gb, axis=-1)
    cos = dot / jnp.maximum(np_ * ng, _EPS)
    cos_loss = jnp.mean(jnp.sum(cos, axis=1), axis=0)
    bl_loss = jnp.mean(jnp.sum((np_ - ng) ** 2, axis=1), axis=0)
    return cos_loss, bl_loss


if __name__ == "__main__":
    parents = get_kinematic_parents()
    key = jax.random.PRNGKey(0)

    # B=2: canonical small case (padded to one sublane tile).
    # B=37: exercises 2 grid tiles + ragged last-tile masking (32 + 5 rows).
    for B in (2, 37):
        key, k1, k2 = jax.random.split(key, 3)
        pose_pred = jax.random.normal(k1, (B, NUM_JOINTS, 3), dtype=jnp.float32)
        pose_gt = jax.random.normal(k2, (B, NUM_JOINTS, 3), dtype=jnp.float32)

        cos_loss, bone_length_loss = loss_func_limb(pose_pred, pose_gt, parents)
        jax.block_until_ready((cos_loss, bone_length_loss))

        ref_cos, ref_bl = _reference(pose_pred, pose_gt, parents)
        assert jnp.allclose(cos_loss, ref_cos, rtol=1e-4, atol=1e-5), \
            (B, cos_loss, ref_cos)
        assert jnp.allclose(bone_length_loss, ref_bl, rtol=1e-4, atol=1e-5), \
            (B, bone_length_loss, ref_bl)

    print("KERNEL_OK")
</pallas_src>

<mosaic_0001>
module attributes {stable_mosaic.version = 11 : i64} {
  func.func @kernel(%arg0: i32, %arg1: memref<8x48xf32, #tpu.memory_space<vmem>>, %arg2: memref<8x48xf32, #tpu.memory_space<vmem>>, %arg3: memref<48x48xf32, #tpu.memory_space<vmem>>, %arg4: memref<144x48xf32, #tpu.memory_space<vmem>>, %arg5: memref<1x2x16xf32, #tpu.memory_space<vmem>>) attributes {dimension_semantics = [#tpu.dimension_semantics<parallel>], iteration_bounds = array<i64: 1>, scalar_prefetch = 0 : i64, scratch_operands = 0 : i64, tpu.core_type = #tpu.core_type<tc>, window_params = [{transform_indices = @transform_0, window_bounds = array<i64: 8, 48>}, {transform_indices = @transform_1, window_bounds = array<i64: 8, 48>}, {pipeline_mode = #tpu.pipeline_mode<synchronous>, transform_indices = @transform_2, window_bounds = array<i64: 48, 48>}, {pipeline_mode = #tpu.pipeline_mode<synchronous>, transform_indices = @transform_3, window_bounds = array<i64: 144, 48>}, {transform_indices = @transform_4, window_bounds = array<i64: 1, 2, 16>}]} {
    %c0 = arith.constant 0 : index
    %c0_0 = arith.constant 0 : index
    %0 = vector.load %arg3[%c0, %c0_0] : memref<48x48xf32, #tpu.memory_space<vmem>>, vector<48x48xf32>
    %c0_1 = arith.constant 0 : index
    %c0_2 = arith.constant 0 : index
    %1 = vector.load %arg4[%c0_1, %c0_2] : memref<144x48xf32, #tpu.memory_space<vmem>>, vector<144x48xf32>
    %c0_3 = arith.constant 0 : index
    %c0_4 = arith.constant 0 : index
    %2 = vector.load %arg1[%c0_3, %c0_4] : memref<8x48xf32, #tpu.memory_space<vmem>>, vector<8x48xf32>
    %cst = arith.constant dense<0.000000e+00> : vector<8x48xf32>
    %3 = tpu.matmul %2, %0, %cst {dimension_numbers = #tpu.dot_dimension_numbers<[1], [0], [0], [1], [0, 0, 1, 1], [], []>, precision = #tpu.contract_precision<fp32>} : vector<8x48xf32>, vector<48x48xf32>, vector<8x48xf32> -> vector<8x48xf32>
    %c0_5 = arith.constant 0 : index
    %c0_6 = arith.constant 0 : index
    %4 = vector.load %arg2[%c0_5, %c0_6] : memref<8x48xf32, #tpu.memory_space<vmem>>, vector<8x48xf32>
    %cst_7 = arith.constant dense<0.000000e+00> : vector<8x48xf32>
    %5 = tpu.matmul %4, %0, %cst_7 {dimension_numbers = #tpu.dot_dimension_numbers<[1], [0], [0], [1], [0, 0, 1, 1], [], []>, precision = #tpu.contract_precision<fp32>} : vector<8x48xf32>, vector<48x48xf32>, vector<8x48xf32> -> vector<8x48xf32>
    %6 = arith.mulf %3, %5 : vector<8x48xf32>
    %7 = arith.mulf %3, %3 : vector<8x48xf32>
    %8 = arith.mulf %5, %5 : vector<8x48xf32>
    %9 = tpu.concatenate %6, %7, %8 in 1 : vector<8x48xf32>, vector<8x48xf32>, vector<8x48xf32> -> vector<8x144xf32>
    %cst_8 = arith.constant dense<0.000000e+00> : vector<8x48xf32>
    %10 = tpu.matmul %9, %1, %cst_8 {dimension_numbers = #tpu.dot_dimension_numbers<[1], [0], [0], [1], [0, 0, 1, 1], [], []>, precision = #tpu.contract_precision<fp32>} : vector<8x144xf32>, vector<144x48xf32>, vector<8x48xf32> -> vector<8x48xf32>
    %11 = vector.extract_strided_slice %10 {offsets = [0, 0], sizes = [8, 16], strides = [1, 1]} : vector<8x48xf32> to vector<8x16xf32>
    %12 = vector.extract_strided_slice %10 {offsets = [0, 16], sizes = [8, 16], strides = [1, 1]} : vector<8x48xf32> to vector<8x16xf32>
    %13 = vector.extract_strided_slice %10 {offsets = [0, 32], sizes = [8, 16], strides = [1, 1]} : vector<8x48xf32> to vector<8x16xf32>
    %14 = arith.mulf %12, %13 : vector<8x16xf32>
    %cst_9 = arith.constant 1.000000e-16 : f32
    %15 = vector.broadcast %cst_9 : f32 to vector<8x16xf32>
    %16 = arith.maximumf %14, %15 : vector<8x16xf32>
    %17 = math.rsqrt %16 : vector<8x16xf32>
    %18 = arith.mulf %11, %17 : vector<8x16xf32>
    %19 = arith.addf %12, %13 : vector<8x16xf32>
    %20 = arith.mulf %14, %17 : vector<8x16xf32>
    %cst_10 = arith.constant 2.000000e+00 : f32
    %21 = vector.broadcast %cst_10 : f32 to vector<8x16xf32>
    %22 = arith.mulf %21, %20 : vector<8x16xf32>
    %23 = arith.subf %19, %22 : vector<8x16xf32>
    %cst_11 = arith.constant 1.000000e+00 : f32
    %24 = vector.broadcast %cst_11 : f32 to vector<8x8xf32>
    %cst_12 = arith.constant dense<0.000000e+00> : vector<8x16xf32>
    %25 = tpu.matmul %24, %18, %cst_12 {dimension_numbers = #tpu.dot_dimension_numbers<[1], [0], [0], [1], [0, 0, 1, 1], [], []>, precision = #tpu.contract_precision<fp32>} : vector<8x8xf32>, vector<8x16xf32>, vector<8x16xf32> -> vector<8x16xf32>
    %cst_13 = arith.constant dense<0.000000e+00> : vector<8x16xf32>
    %26 = tpu.matmul %24, %23, %cst_13 {dimension_numbers = #tpu.dot_dimension_numbers<[1], [0], [0], [1], [0, 0, 1, 1], [], []>, precision = #tpu.contract_precision<fp32>} : vector<8x8xf32>, vector<8x16xf32>, vector<8x16xf32> -> vector<8x16xf32>
    %27 = vector.extract_strided_slice %25 {offsets = [0, 0], sizes = [1, 16], strides = [1, 1]} : vector<8x16xf32> to vector<1x16xf32>
    %28 = vector.extract_strided_slice %26 {offsets = [0, 0], sizes = [1, 16], strides = [1, 1]} : vector<8x16xf32> to vector<1x16xf32>
    %29 = tpu.concatenate %27, %28 in 0 : vector<1x16xf32>, vector<1x16xf32> -> vector<2x16xf32>
    %c0_14 = arith.constant 0 : index
    %c0_15 = arith.constant 0 : index
    %c0_16 = arith.constant 0 : index
    %30 = vector.load %arg5[%c0_14, %c0_15, %c0_16] : memref<1x2x16xf32, #tpu.memory_space<vmem>>, vector<1x2x16xf32>
    %31 = vector.shape_cast %30 : vector<1x2x16xf32> to vector<2x16xf32>
    %32 = vector.shape_cast %29 : vector<2x16xf32> to vector<1x2x16xf32>
    tpu.vector_store %arg5[%c0_14, %c0_15, %c0_16], %32 {strides = array<i32>} : memref<1x2x16xf32, #tpu.memory_space<vmem>>, vector<1x2x16xf32>,
    return
  }
  func.func @transform_0(%arg0: i32) -> (i32, i32) {
    %c0_i32 = arith.constant 0 : i32
    %c0_i32_0 = arith.constant 0 : i32
    return %arg0, %c0_i32 : i32, i32
  }
  func.func @transform_1(%arg0: i32) -> (i32, i32) {
    %c0_i32 = arith.constant 0 : i32
    %c0_i32_0 = arith.constant 0 : i32
    return %arg0, %c0_i32 : i32, i32
  }
  func.func @transform_2(%arg0: i32) -> (i32, i32) {
    %c0_i32 = arith.constant 0 : i32
    %c0_i32_0 = arith.constant 0 : i32
    %c0_i32_1 = arith.constant 0 : i32
    return %c0_i32, %c0_i32_0 : i32, i32
  }
  func.func @transform_3(%arg0: i32) -> (i32, i32) {
    %c0_i32 = arith.constant 0 : i32
    %c0_i32_0 = arith.constant 0 : i32
    %c0_i32_1 = arith.constant 0 : i32
    return %c0_i32, %c0_i32_0 : i32, i32
  }
  func.func @transform_4(%arg0: i32) -> (i32, i32, i32) {
    %c0_i32 = arith.constant 0 : i32
    %c0_i32_0 = arith.constant 0 : i32
    %c0_i32_1 = arith.constant 0 : i32
    return %arg0, %c0_i32, %c0_i32_0 : i32, i32, i32
  }
}

</mosaic_0001>

<bundles_post_ra>
// kernel: _loss_func_limb_jit.1
= control target key start
LH: loop header
LB: loop body
LE: loop exit
PB: predicated region body
PF: predicated region fallthrough
CT: control target
= control target key end

     0   :  { %9 = vsyncpa [#allocation3], 0  ;;  %s3099_s15 = smov [#allocation2]   ;;  %s3926_s0 = inlined_call_operand.vmem [shape: f32[8,48], index: 0, kind: input, shape index: {}]   ;;  %s3927_s1 = inlined_call_operand.vmem [shape: f32[8,48], index: 1, kind: input, shape index: {}]   ;;  %s3928_s2 = inlined_call_operand.hbm [shape: f32[48,48], index: 2, kind: input, shape index: {}]   ;;  %s3929_s3 = inlined_call_operand.vmem [shape: f32[144,48], index: 3, kind: input, shape index: {}]   ;;  %s3930_s4 = inlined_call_operand.vmem [shape: f32[1,2,16], index: 4, kind: output, shape index: {}]  }
   0x1   :  { %s19_s16 = sshll.u32 %s3099_s15, 4  ;;  %s20_s16 = int_to_ptr.vmem [resolvable:$true] %s19_s16 }
   0x2   :  { %s3085_s17 = scalar_lea.vmem %s20_s16, 768  ;;  %p3090_p1 = scmp.lt.s32.totalorder %s20_s16, %s20_s16 }
   0x3   :  { %p3086_p0 = scmp.ne.s32.totalorder %s20_s16, %s3085_s17  ;;  %p3091_p2 = scmp.lt.s32.totalorder %s3085_s17, %s3085_s17 }
   0x5   :  { %p3092_p3 = por %p3091_p2, %p3090_p1 }
   0x7   :  { %p3093_p4 = pnand %p3092_p3, %p3086_p0 }
   0x9   :  { %3096 = shalt.err (!%p3093_p4)
}
   0xa   :  { %s3100_s18 = smov 128   ;;  %s3101_s19 = smov 8  }
   0xb   :  { %25 = dma.hbm_to_vmem [thread:$0]  %s3928_s2, 768, %s20_s16, [#allocation3], %s3100_s18, %s3100_s18, %s3101_s19  }
   0xc   :  { %3097 = dma.done.wait [#allocation3], 768  }
   0xd   :  { %3098 = vsyncadd [#allocation3], 4294966528  ;;  %v3102_v0 = vmov 0.0   ;;  %vm3103_vm0 = vmmov 0   ;;  %v36_v1 = vld [vmem:[#allocation2 + $0x28] sm:$0xff]  ;;  %v35_v2 = vld [vmem:[#allocation2 + $0x20] sm:$0xff] }
   0xe   :  { %2825 = vmatprep.subr.mxu0 %v3102_v0  ;;  %2840 = vmatprep.subr.mxu1 %v3102_v0  ;;  %v34_v3 = vld [vmem:[#allocation2 + $0x18] sm:$0xff]  ;;  %vm56_vm1 = vcmask 392192   ;;  %v3143_v4 = vand.u32 4294901760, %v36_v1  ;;  %v3145_v5 = vand.u32 4294901760, %v35_v2  ;;  %v33_v7 = vld [vmem:[#allocation2 + $0x10] sm:$0xff]  ;;  %v32_v8 = vld [vmem:[#allocation2 + $0x8] sm:$0xff] }
   0xf   :  { %2837 = vmatprep.mubr.msk.f32.mxu0 %vm3103_vm0, %v3102_v0  ;;  %2852 = vmatprep.mubr.msk.f32.mxu1 %vm3103_vm0, %v3102_v0  ;;  %v3147_v6 = vand.u32 4294901760, %v34_v3  ;;  %v31_v9 = vld [vmem:[#allocation2] sm:$0xff]  ;;  %v3149_v10 = vand.u32 4294901760, %v33_v7  ;;  %v3151_v11 = vand.u32 4294901760, %v32_v8  ;;  %v55_v13 = vld [vmem:[%s3926_s0] sm:$0xff]  ;;  %v52_v61 = vld [vmem:[%s3929_s3 + $0x78] sm:$0xff] }
  0x10   :  { %v3153_v12 = vand.u32 4294901760, %v31_v9  ;;  %2826 = vmatpush3.msra.mxu0 %v3143_v4  ;;  %v3160_v14 = vsub.f32 %v36_v1, %v3143_v4  ;;  %v3163_v15 = vsub.f32 %v35_v2, %v3145_v5  ;;  %v58_v16 = vsel %vm56_vm1, %v55_v13, 0  ;;  %v571_v44 = vld [vmem:[%s3927_s1] sm:$0xff]  ;;  %v51_v63 = vld [vmem:[%s3929_s3 + $0x70] sm:$0xff]  ;;  %v50_v1 = vld [vmem:[%s3929_s3 + $0x68] sm:$0xff]  ;;  %s3104_s22 = smov 48  }
  0x11   :  { %v3167_v17 = vsub.f32 %v34_v3, %v3147_v6  ;;  %2827 = vmatprep.subr.mxu0 %v3102_v0  ;;  %v3170_v18 = vand.u32 4294901760, %v58_v16  ;;  %v3173_v19 = vsub.f32 %v33_v7, %v3149_v10  ;;  %v3176_v20 = vsub.f32 %v32_v8, %v3151_v11  ;;  %v49_v2 = vld [vmem:[%s3929_s3 + $0x60] sm:$0xff]  ;;  %v48_v8 = vld [vmem:[%s3929_s3 + $0x58] sm:$0xff]  ;;  %s3106_s5 = smov 112  }
  0x12   :  { %2828 = vmatpush3.msra.mxu0 %v3145_v5  ;;  %v3180_v21 = vand.u32 4294901760, %v3160_v14  ;;  %v3183_v22 = vand.u32 4294901760, %v3163_v15  ;;  %v3189_v24 = vsub.f32 %v31_v9, %v3153_v12  ;;  %v573_v45 = vsel %vm56_vm1, %v571_v44, 0  ;;  %v47_v9 = vld [vmem:[%s3929_s3 + $0x50] sm:$0xff]  ;;  %v41_v44 = vld [vmem:[%s3929_s3 + $0x20] sm:$0xff] }
  0x13   :  { %v3186_v23 = vand.u32 4294901760, %v3167_v17  ;;  %2829 = vmatprep.subr.mxu0 %v3102_v0  ;;  %v3193_v25 = vsub.f32 %v58_v16, %v3170_v18  ;;  %v3196_v26 = vand.u32 4294901760, %v3173_v19  ;;  %v3206_v30 = vand.u32 4294901760, %v3176_v20 }
  0x14   :  { %2830 = vmatpush3.msra.mxu0 %v3147_v6  ;;  %v165_v27 = vsub.f32 %v3160_v14, %v3180_v21  ;;  %v172_v28 = vsub.f32 %v3163_v15, %v3183_v22  ;;  %v3218_v35 = vand.u32 4294901760, %v3189_v24  ;;  %v3294_v46 = vand.u32 4294901760, %v573_v45 }
  0x15   :  { %v179_v29 = vsub.f32 %v3167_v17, %v3186_v23  ;;  %2831 = vmatprep.subr.mxu0 %v3102_v0  ;;  %v133_v31 = vand.u32 4294901760, %v3193_v25  ;;  %v186_v34 = vsub.f32 %v3173_v19, %v3196_v26  ;;  %v193_v38 = vsub.f32 %v3176_v20, %v3206_v30 }
  0x16   :  { %2832 = vmatpush3.msra.mxu0 %v3149_v10  ;;  %v3211_v32 = vand.u32 4294901760, %v165_v27  ;;  %v3213_v33 = vand.u32 4294901760, %v172_v28  ;;  %v200_v41 = vsub.f32 %v3189_v24, %v3218_v35  ;;  %v3306_v47 = vsub.f32 %v573_v45, %v3294_v46 }
  0x17   :  { %2833 = vmatprep.subr.mxu0 %v3102_v0  ;;  %v134_v36 = vsub.f32 %v3193_v25, %v133_v31  ;;  %v3226_v37 = vand.u32 4294901760, %v179_v29  ;;  %v3234_v40 = vand.u32 4294901760, %v186_v34  ;;  %v3241_v42 = vand.u32 4294901760, %v193_v38  ;;  %v44_v38 = vld [vmem:[%s3929_s3 + $0x38] sm:$0xff] }
  0x18   :  { %2834 = vmatpush3.msra.mxu0 %v3151_v11  ;;  %2841 = vmatpush3.msra.mxu1 %v3211_v32  ;;  %v3247_v43 = vand.u32 4294901760, %v200_v41  ;;  %v648_v48 = vand.u32 4294901760, %v3306_v47  ;;  %v3420_v62 = vand.u32 4294901760, %v52_v61  ;;  %v3435_v7 = vand.u32 4294901760, %v49_v2 }
  0x19   :  { %2835 = vmatprep.subr.mxu0 %v3102_v0  ;;  %2842 = vmatprep.subr.mxu1 %v3102_v0  ;;  %v135_v39 = vand.u32 4294901760, %v134_v36  ;;  %v3452_v13 = vand.u32 4294901760, %v47_v9  ;;  %vm1098_vm2 = vcmask 785408   ;;  %vm1100_vm3 = vcmask 130048  }
  0x1a   :  { %2836 = vmatpush3.msra.mxu0 %v3153_v12  ;;  %2843 = vmatpush3.msra.mxu1 %v3213_v33  ;;  %v649_v49 = vsub.f32 %v3306_v47, %v648_v48  ;;  %vm1799_vm4 = vcmask 64512   ;;  %vm2702_vm5 = vcmask 1040384   ;;  %vm2704_vm6 = vcmask 123904  }
  0x1b   :  { %2844 = vmatprep.subr.mxu1 %v3102_v0  ;;  %2855 = vmatprep.subr.mxu0 %v3102_v0 }
  0x1c   :  { %2838 = vmatmul.mubr.f32.vlgmr.msra.gmra.mxu0 %v135_v39  ;;  %2845 = vmatpush3.msra.mxu1 %v3226_v37  ;;  %v650_v50 = vand.u32 4294901760, %v649_v49  ;;  %v43_v39 = vld [vmem:[%s3929_s3 + $0x30] sm:$0xff] }
  0x1d   :  { %2856 = vmatpush3.msra.mxu0 %v3160_v14  ;;  %2846 = vmatprep.subr.mxu1 %v3102_v0 }
  0x1e   :  { %2857 = vmatprep.subr.mxu0 %v3102_v0  ;;  %2847 = vmatpush3.msra.mxu1 %v3234_v40 }
  0x1f   :  { %2858 = vmatpush3.msra.mxu0 %v3163_v15  ;;  %2848 = vmatprep.subr.mxu1 %v3102_v0 }
  0x20   :  { %2859 = vmatprep.subr.mxu0 %v3102_v0  ;;  %2849 = vmatpush3.msra.mxu1 %v3241_v42 }
  0x21   :  { %2860 = vmatpush3.msra.mxu0 %v3167_v17  ;;  %2850 = vmatprep.subr.mxu1 %v3102_v0 }
  0x22   :  { %2861 = vmatprep.subr.mxu0 %v3102_v0  ;;  %2851 = vmatpush3.msra.mxu1 %v3247_v43 }
  0x23   :  { %2862 = vmatpush3.msra.mxu0 %v3173_v19  ;;  %2853 = vmatmul.mubr.f32.vlgmr.msra.gmra.mxu1 %v3170_v18 }
  0x24   :  { %2863 = vmatprep.subr.mxu0 %v3102_v0  ;;  %2870 = vmatprep.subr.mxu1 %v3102_v0 }
  0x25   :  { %2864 = vmatpush3.msra.mxu0 %v3176_v20  ;;  %2871 = vmatpush3.msra.mxu1 %v3143_v4 }
  0x26   :  { %2865 = vmatprep.subr.mxu0 %v3102_v0  ;;  %2872 = vmatprep.subr.mxu1 %v3102_v0 }
  0x27   :  { %2866 = vmatpush3.msra.mxu0 %v3189_v24  ;;  %2867 = vmatprep.mubr.msk.f32.mxu0 %vm3103_vm0, %v3102_v0 }
  0x28   :  { %2873 = vmatpush3.msra.mxu1 %v3145_v5  ;;  %2868 = vmatmul.mubr.f32.vlgmr.msra.gmra.mxu0 %v3193_v25 }
  0x29   :  { %2874 = vmatprep.subr.mxu1 %v3102_v0  ;;  %2885 = vmatprep.subr.mxu0 %v3102_v0 }
  0x2a   :  { %2875 = vmatpush3.msra.mxu1 %v3147_v6  ;;  %2886 = vmatpush3.msra.mxu0 %v3180_v21 }
  0x2b   :  { %2876 = vmatprep.subr.mxu1 %v3102_v0  ;;  %2887 = vmatprep.subr.mxu0 %v3102_v0 }
  0x2c   :  { %2877 = vmatpush3.msra.mxu1 %v3149_v10  ;;  %2888 = vmatpush3.msra.mxu0 %v3183_v22 }
  0x2d   :  { %2878 = vmatprep.subr.mxu1 %v3102_v0  ;;  %2889 = vmatprep.subr.mxu0 %v3102_v0 }
  0x2e   :  { %2879 = vmatpush3.msra.mxu1 %v3151_v11  ;;  %2890 = vmatpush3.msra.mxu0 %v3186_v23 }
  0x2f   :  { %2880 = vmatprep.subr.mxu1 %v3102_v0  ;;  %2891 = vmatprep.subr.mxu0 %v3102_v0 }
  0x30   :  { %2881 = vmatpush3.msra.mxu1 %v3153_v12  ;;  %2882 = vmatprep.mubr.msk.f32.mxu1 %vm3103_vm0, %v3102_v0 }
  0x31   :  { %2892 = vmatpush3.msra.mxu0 %v3196_v26  ;;  %2883 = vmatmul.mubr.f32.vlgmr.msra.gmra.mxu1 %v133_v31 }
  0x32   :  { %2893 = vmatprep.subr.mxu0 %v3102_v0  ;;  %2900 = vmatprep.subr.mxu1 %v3102_v0 }
  0x33   :  { %2894 = vmatpush3.msra.mxu0 %v3206_v30  ;;  %2901 = vmatpush3.msra.mxu1 %v3143_v4 }
  0x34   :  { %2895 = vmatprep.subr.mxu0 %v3102_v0  ;;  %2902 = vmatprep.subr.mxu1 %v3102_v0 }
  0x35   :  { %2896 = vmatpush3.msra.mxu0 %v3218_v35  ;;  %2897 = vmatprep.mubr.msk.f32.mxu0 %vm3103_vm0, %v3102_v0 }
  0x36   :  { %2903 = vmatpush3.msra.mxu1 %v3145_v5  ;;  %2898 = vmatmul.mubr.f32.vlgmr.msra.gmra.mxu0 %v3170_v18 }
  0x37   :  { %2904 = vmatprep.subr.mxu1 %v3102_v0  ;;  %2915 = vmatprep.subr.mxu0 %v3102_v0 }
  0x38   :  { %2905 = vmatpush3.msra.mxu1 %v3147_v6  ;;  %2916 = vmatpush3.msra.mxu0 %v3143_v4 }
  0x39   :  { %2906 = vmatprep.subr.mxu1 %v3102_v0  ;;  %2917 = vmatprep.subr.mxu0 %v3102_v0 }
  0x3a   :  { %2907 = vmatpush3.msra.mxu1 %v3149_v10  ;;  %2918 = vmatpush3.msra.mxu0 %v3145_v5 }
  0x3b   :  { %2908 = vmatprep.subr.mxu1 %v3102_v0  ;;  %2919 = vmatprep.subr.mxu0 %v3102_v0 }
  0x3c   :  { %2909 = vmatpush3.msra.mxu1 %v3151_v11  ;;  %2920 = vmatpush3.msra.mxu0 %v3147_v6 }
  0x3d   :  { %2910 = vmatprep.subr.mxu1 %v3102_v0  ;;  %2921 = vmatprep.subr.mxu0 %v3102_v0 }
  0x3e   :  { %2911 = vmatpush3.msra.mxu1 %v3153_v12  ;;  %2912 = vmatprep.mubr.msk.f32.mxu1 %vm3103_vm0, %v3102_v0 }
  0x3f   :  { %2922 = vmatpush3.msra.mxu0 %v3149_v10  ;;  %2913 = vmatmul.mubr.f32.vlgmr.msra.gmra.mxu1 %v3170_v18  ;;  %v3466_v18 = vsub.f32 %v49_v2, %v3435_v7 }
  0x40   :  { %2923 = vmatprep.subr.mxu0 %v3102_v0  ;;  %2930 = vmatprep.subr.mxu1 %v3102_v0 }
  0x41   :  { %2924 = vmatpush3.msra.mxu0 %v3151_v11  ;;  %2931 = vmatpush3.msra.mxu1 %v3211_v32 }
  0x42   :  { %2925 = vmatprep.subr.mxu0 %v3102_v0  ;;  %2932 = vmatprep.subr.mxu1 %v3102_v0 }
  0x43   :  { %2926 = vmatpush3.msra.mxu0 %v3153_v12  ;;  %2933 = vmatpush3.msra.mxu1 %v3213_v33 }
  0x44   :  { %2927 = vmatprep.mubr.msk.f32.mxu0 %vm3103_vm0, %v3102_v0  ;;  %2934 = vmatprep.subr.mxu1 %v3102_v0 }
  0x45   :  { %2945 = vmatprep.subr.mxu0 %v3102_v0  ;;  %2928 = vmatmul.mubr.f32.vlgmr.msra.gmra.mxu0 %v650_v50  ;;  %v3530_v50 = vand.u32 4294901760, %v44_v38 }
  0x46   :  { %2935 = vmatpush3.msra.mxu1 %v3226_v37  ;;  %2946 = vmatpush3.msra.mxu0 %v3160_v14 }
  0x47   :  { %2936 = vmatprep.subr.mxu1 %v3102_v0  ;;  %2947 = vmatprep.subr.mxu0 %v3102_v0 }
  0x48   :  { %2937 = vmatpush3.msra.mxu1 %v3234_v40  ;;  %2948 = vmatpush3.msra.mxu0 %v3163_v15  ;;  %v45_v15 = vld [vmem:[%s3929_s3 + $0x40] sm:$0xff]  ;;  %v42_v40 = vld [vmem:[%s3929_s3 + $0x28] sm:$0xff] }
  0x49   :  { %2938 = vmatprep.subr.mxu1 %v3102_v0  ;;  %2949 = vmatprep.subr.mxu0 %v3102_v0 }
  0x4a   :  { %2939 = vmatpush3.msra.mxu1 %v3241_v42  ;;  %2950 = vmatpush3.msra.mxu0 %v3167_v17 }
  0x4b   :  { %2940 = vmatprep.subr.mxu1 %v3102_v0  ;;  %2951 = vmatprep.subr.mxu0 %v3102_v0 }
  0x4c   :  { %2941 = vmatpush3.msra.mxu1 %v3247_v43  ;;  %2942 = vmatprep.mubr.msk.f32.mxu1 %vm3103_vm0, %v3102_v0 }
  0x4d   :  { %2952 = vmatpush3.msra.mxu0 %v3173_v19  ;;  %2943 = vmatmul.mubr.f32.vlgmr.msra.gmra.mxu1 %v3294_v46  ;;  %v3469_v19 = vand.u32 4294901760, %v45_v15 }
  0x4e   :  { %2953 = vmatprep.subr.mxu0 %v3102_v0  ;;  %2960 = vmatprep.subr.mxu1 %v3102_v0 }
  0x4f   :  { %2954 = vmatpush3.msra.mxu0 %v3176_v20  ;;  %2961 = vmatpush3.msra.mxu1 %v3143_v4 }
  0x50   :  { %2955 = vmatprep.subr.mxu0 %v3102_v0  ;;  %2962 = vmatprep.subr.mxu1 %v3102_v0 }
  0x51   :  { %2956 = vmatpush3.msra.mxu0 %v3189_v24  ;;  %2957 = vmatprep.mubr.msk.f32.mxu0 %vm3103_vm0, %v3102_v0 }
  0x52   :  { %2963 = vmatpush3.msra.mxu1 %v3145_v5  ;;  %2958 = vmatmul.mubr.f32.vlgmr.msra.gmra.mxu0 %v3306_v47 }
  0x53   :  { %2964 = vmatprep.subr.mxu1 %v3102_v0  ;;  %2975 = vmatprep.subr.mxu0 %v3102_v0 }
  0x54   :  { %2965 = vmatpush3.msra.mxu1 %v3147_v6  ;;  %2976 = vmatpush3.msra.mxu0 %v3180_v21 }
  0x55   :  { %2966 = vmatprep.subr.mxu1 %v3102_v0  ;;  %2977 = vmatprep.subr.mxu0 %v3102_v0 }
  0x56   :  { %2967 = vmatpush3.msra.mxu1 %v3149_v10  ;;  %2978 = vmatpush3.msra.mxu0 %v3183_v22 }
  0x57   :  { %2968 = vmatprep.subr.mxu1 %v3102_v0  ;;  %2979 = vmatprep.subr.mxu0 %v3102_v0 }
  0x58   :  { %2969 = vmatpush3.msra.mxu1 %v3151_v11  ;;  %2980 = vmatpush3.msra.mxu0 %v3186_v23  ;;  %v3477_v23 = vsub.f32 %v47_v9, %v3452_v13 }
  0x59   :  { %2970 = vmatprep.subr.mxu1 %v3102_v0  ;;  %2981 = vmatprep.subr.mxu0 %v3102_v0 }
  0x5a   :  { %2971 = vmatpush3.msra.mxu1 %v3153_v12  ;;  %2972 = vmatprep.mubr.msk.f32.mxu1 %vm3103_vm0, %v3102_v0  ;;  %v1239_v37 = vand.u32 4294901760, %v3477_v23 }
  0x5b   :  { %2982 = vmatpush3.msra.mxu0 %v3196_v26  ;;  %2973 = vmatmul.mubr.f32.vlgmr.msra.gmra.mxu1 %v648_v48  ;;  %v1225_v26 = vand.u32 4294901760, %v3466_v18 }
  0x5c   :  { %2983 = vmatprep.subr.mxu0 %v3102_v0  ;;  %2990 = vmatprep.subr.mxu1 %v3102_v0 }
  0x5d   :  { %2984 = vmatpush3.msra.mxu0 %v3206_v30  ;;  %2991 = vmatpush3.msra.mxu1 %v3143_v4  ;;  %v3492_v30 = vsub.f32 %v45_v15, %v3469_v19  ;;  %v1226_v36 = vsub.f32 %v3466_v18, %v1225_v26 }
  0x5e   :  { %2985 = vmatprep.subr.mxu0 %v3102_v0  ;;  %2992 = vmatprep.subr.mxu1 %v3102_v0 }
  0x5f   :  { %2986 = vmatpush3.msra.mxu0 %v3218_v35  ;;  %2987 = vmatprep.mubr.msk.f32.mxu0 %vm3103_vm0, %v3102_v0  ;;  %v1253_v48 = vand.u32 4294901760, %v3492_v30 }
  0x60   :  { %2993 = vmatpush3.msra.mxu1 %v3145_v5  ;;  %2988 = vmatmul.mubr.f32.vlgmr.msra.gmra.mxu0 %v3294_v46  ;;  %v3431_v5 = vand.u32 4294901760, %v51_v63 }
  0x61   :  { %2994 = vmatprep.subr.mxu1 %v3102_v0  ;;  %3002 = vmatprep.mubr.msk.f32.mxu1 %vm3103_vm0, %v3102_v0 }
  0x62   :  { %2995 = vmatpush3.msra.mxu1 %v3147_v6  ;;  %1103 = vmatprep.subr.mxu0 %v3102_v0  ;;  %v3433_v6 = vand.u32 4294901760, %v50_v1  ;;  %v3460_v16 = vsub.f32 %v51_v63, %v3431_v5 }
  0x63   :  { %2996 = vmatprep.subr.mxu1 %v3102_v0  ;;  %1105 = vmatpush1.msra.mxu0 %v3420_v62 }
  0x64   :  { %2997 = vmatpush3.msra.mxu1 %v3149_v10  ;;  %v46_v10 = vld [vmem:[%s3929_s3 + $0x48] sm:$0xff]  ;;  %v3463_v17 = vsub.f32 %v50_v1, %v3433_v6  ;;  %1106 = vmatprep.subr.mxu0 %v3102_v0  ;;  %v1211_v24 = vand.u32 4294901760, %v3460_v16 }
  0x65   :  { %2998 = vmatprep.subr.mxu1 %v3102_v0  ;;  %v3454_v14 = vand.u32 4294901760, %v46_v10  ;;  %1108 = vmatpush1.msra.mxu0 %v3431_v5 }
  0x66   :  { %2999 = vmatpush3.msra.mxu1 %v3151_v11  ;;  %v3447_v11 = vsub.f32 %v52_v61, %v3420_v62  ;;  %v1218_v25 = vand.u32 4294901760, %v3463_v17  ;;  %1109 = vmatprep.subr.mxu0 %v3102_v0  ;;  %v1212_v32 = vsub.f32 %v3460_v16, %v1211_v24 }
  0x67   :  { %3000 = vmatprep.subr.mxu1 %v3102_v0  ;;  %v3484_v27 = vsub.f32 %v46_v10, %v3454_v14  ;;  %1111 = vmatpush1.msra.mxu0 %v3433_v6 }
  0x68   :  { %3001 = vmatpush3.msra.mxu1 %v3153_v12  ;;  %v3450_v12 = vand.u32 4294901760, %v48_v8  ;;  %v1204_v21 = vand.u32 4294901760, %v3447_v11  ;;  %v1219_v33 = vsub.f32 %v3463_v17, %v1218_v25  ;;  %1112 = vmatprep.subr.mxu0 %v3102_v0  ;;  %v1213_v42 = vand.u32 4294901760, %v1212_v32  ;;  %v37_v32 = vld [vmem:[%s3929_s3] sm:$0xff] }
  0x69   :  { %3003 = vmatmul.mubr.f32.vlgmr.msra.gmra.mxu1 %v3294_v46  ;;  %1201 = vmatprep.subr.mxu1 %v3102_v0  ;;  %v1246_v43 = vand.u32 4294901760, %v3484_v27 }
  0x6a   :  { %v3473_v22 = vsub.f32 %v48_v8, %v3450_v12  ;;  %v1205_v28 = vsub.f32 %v3447_v11, %v1204_v21  ;;  %1114 = vmatpush1.msra.mxu0 %v3435_v7  ;;  %v1220_v46 = vand.u32 4294901760, %v1219_v33  ;;  %v38_v8 = vld [vmem:[%s3929_s3 + $0x8] sm:$0xff] }
  0x6b   :  { %1115 = vmatprep.subr.mxu0 %v3102_v0 }
  0x6c   :  { %v1232_v29 = vand.u32 4294901760, %v3473_v22  ;;  %v1206_v35 = vand.u32 4294901760, %v1205_v28  ;;  %1117 = vmatpush1.msra.mxu0 %v3450_v12 }
  0x6d   :  { %1118 = vmatprep.subr.mxu0 %v3102_v0 }
  0x6e   :  { %1207 = vmatpush1.msra.mxu1 %v1206_v35  ;;  %v1233_v47 = vsub.f32 %v3473_v22, %v1232_v29  ;;  %1120 = vmatpush1.msra.mxu0 %v3452_v13 }
  0x6f   :  { %1208 = vmatprep.subr.mxu1 %v3102_v0  ;;  %1121 = vmatprep.subr.mxu0 %v3102_v0 }
  0x70   :  { %1214 = vmatpush1.msra.mxu1 %v1213_v42  ;;  %v1234_v63 = vand.u32 4294901760, %v1233_v47  ;;  %1123 = vmatpush1.msra.mxu0 %v3454_v14 }
  0x71   :  { %1215 = vmatprep.subr.mxu1 %v3102_v0  ;;  %1124 = vmatprep.subr.mxu0 %v3102_v0 }
  0x72   :  { %1221 = vmatpush1.msra.mxu1 %v1220_v46  ;;  %1126 = vmatpush1.msra.mxu0 %v3469_v19 }
  0x73   :  { %1222 = vmatprep.subr.mxu1 %v3102_v0  ;;  %1127 = vmatprep.subr.mxu0 %v3102_v0 }
  0x74   :  { %1129 = vmatpush1.msra.mxu0 %v3530_v50 }
  0x75   :  { %1130 = vmatprep.subr.mxu0 %v3102_v0 }
  0xdc   :  { %v137_v51 = vpop.f32.mrf.mxu0 }
  0xde   :  { %v2839_v52 = vpop.f32.mrf.mxu0 }
  0xdf   :  { %v3535_v52 = vand.u32 4294901760, %v42_v40 }
  0xe1   :  { %v3563_v1 = vsub.f32 %v42_v40, %v3535_v52 }
  0xe3   :  { %v238_v53 = vpop.f32.mrf.mxu1 }
  0xe4   :  { %v239_v59 = vadd.f32 %v238_v53, %v137_v51  ;;  %v3533_v51 = vand.u32 4294901760, %v43_v39  ;;  %v40_v53 = vld [vmem:[%s3929_s3 + $0x18] sm:$0xff] }
  0xe5   :  { %v2854_v54 = vpop.f32.mrf.mxu1  ;;  %v3565_v2 = vand.u32 4294901760, %v40_v53 }
  0xe6   :  { %v1227_v54 = vand.u32 4294901760, %v1226_v36  ;;  %v3596_v36 = vand.u32 4294901760, %v38_v8  ;;  %1132 = vmatpush1.msra.mxu0 %v3533_v51 }
  0xe7   :  { %v3594_v35 = vsub.f32 %v40_v53, %v3565_v2  ;;  %1133 = vmatprep.subr.mxu0 %v3102_v0 }
  0xe8   :  { %v322_v55 = vpop.f32.mrf.mxu0  ;;  %1228 = vmatpush1.msra.mxu1 %v1227_v54  ;;  %v3620_v53 = vsub.f32 %v38_v8, %v3596_v36  ;;  %1135 = vmatpush1.msra.mxu0 %v3535_v52 }
  0xe9   :  { %v323_v3 = vadd.f32 %v322_v55, %v239_v59  ;;  %v1240_v55 = vsub.f32 %v3477_v23, %v1239_v37  ;;  %v3554_v59 = vsub.f32 %v43_v39, %v3533_v51  ;;  %1229 = vmatprep.subr.mxu1 %v3102_v0  ;;  %1136 = vmatprep.subr.mxu0 %v3102_v0 }
  0xea   :  { %v2869_v56 = vpop.f32.mrf.mxu0  ;;  %1235 = vmatpush1.msra.mxu1 %v1234_v63 }
  0xeb   :  { %v3544_v56 = vand.u32 4294901760, %v41_v44  ;;  %v1241_v10 = vand.u32 4294901760, %v1240_v55  ;;  %v3939_v15 = vand.u32 4294901760, %v3554_v59  ;;  %1236 = vmatprep.subr.mxu1 %v3102_v0 }
  0xed   :  { %1242 = vmatpush1.msra.mxu1 %v1241_v10  ;;  %v1268_v39 = vsub.f32 %v3554_v59, %v3939_v15  ;;  %1138 = vmatpush1.msra.mxu0 %v3544_v56 }
  0xee   :  { %1243 = vmatprep.subr.mxu1 %v3102_v0  ;;  %1139 = vmatprep.subr.mxu0 %v3102_v0 }
  0xef   :  { %v1269_v55 = vand.u32 4294901760, %v1268_v39  ;;  %1141 = vmatpush1.msra.mxu0 %v3565_v2 }
  0xf0   :  { %1142 = vmatprep.subr.mxu0 %v3102_v0 }
  0xf1   :  { %v401_v57 = vpop.f32.mrf.mxu1 }
  0xf2   :  { %v402_v20 = vadd.f32 %v401_v57, %v323_v3  ;;  %v1247_v57 = vsub.f32 %v3484_v27, %v1246_v43  ;;  %v1254_v3 = vsub.f32 %v3492_v30, %v1253_v48 }
  0xf3   :  { %v2884_v58 = vpop.f32.mrf.mxu1 }
  0xf4   :  { %v3551_v58 = vsub.f32 %v44_v38, %v3530_v50  ;;  %v1255_v38 = vand.u32 4294901760, %v1254_v3 }
  0xf6   :  { %v490_v60 = vpop.f32.mrf.mxu0 }
  0xf7   :  { %v491_v31 = vadd.f32 %v490_v60, %v402_v20  ;;  %v39_v60 = vld [vmem:[%s3929_s3 + $0x10] sm:$0xff]  ;;  %v3579_v20 = vsub.f32 %v41_v44, %v3544_v56  ;;  %v3608_v44 = vand.u32 4294901760, %v37_v32 }
  0xf8   :  { %v2899_v4 = vpop.f32.mrf.mxu0  ;;  %v3581_v28 = vand.u32 4294901760, %v39_v60 }
  0xf9   :  { %v3940_v4 = vand.u32 4294901760, %v3551_v58  ;;  %v3936_v40 = vand.u32 4294901760, %v3579_v20  ;;  %v3630_v63 = vsub.f32 %v37_v32, %v3608_v44 }
  0xfa   :  { %v3606_v42 = vsub.f32 %v39_v60, %v3581_v28  ;;  %1144 = vmatpush1.msra.mxu0 %v3581_v28 }
  0xfb   :  { %v1261_v33 = vsub.f32 %v3551_v58, %v3940_v4  ;;  %1145 = vmatprep.subr.mxu0 %v3102_v0 }
  0xfc   :  { %v3933_v60 = vand.u32 4294901760, %v3606_v42  ;;  %1147 = vmatpush1.msra.mxu0 %v3596_v36 }
  0xfd   :  { %v1262_v46 = vand.u32 4294901760, %v1261_v33  ;;  %v3931_v33 = vand.u32 4294901760, %v3630_v63  ;;  %1148 = vmatprep.subr.mxu0 %v3102_v0 }
  0xfe   :  { %v1296_v32 = vsub.f32 %v3606_v42, %v3933_v60  ;;  %1150 = vmatpush1.msra.mxu0 %v3608_v44 }
  0xff   :  { %v567_v34 = vpop.f32.mrf.mxu1  ;;  %1179 = vmatprep.subr.mxu0 %v3102_v0 }
 0x100   :  { %v3515_v41 = vadd.f32 %v567_v34, %v491_v31  ;;  %v1248_v31 = vand.u32 4294901760, %v1247_v57  ;;  %v3937_v34 = vand.u32 4294901760, %v3563_v1  ;;  %v1282_v57 = vsub.f32 %v3579_v20, %v3936_v40 }
 0x101   :  { %v2914_v45 = vpop.f32.mrf.mxu1 }
 0x102   :  { %v1087_v49 = vmul.f32 %v3515_v41, %v3515_v41  ;;  %1249 = vmatpush1.msra.mxu1 %v1248_v31  ;;  %v1275_v47 = vsub.f32 %v3563_v1, %v3937_v34  ;;  %v1283_v31 = vand.u32 4294901760, %v1282_v57 }
 0x103   :  { %1250 = vmatprep.subr.mxu1 %v3102_v0 }
 0x104   :  { %1090 = vrot.lane.b32.xlu0 %v1087_v49, %s3104_s22  ;;  %v3935_v49 = vand.u32 4294901760, %v3594_v35  ;;  %1256 = vmatpush1.msra.mxu1 %v1255_v38  ;;  %v1276_v3 = vand.u32 4294901760, %v1275_v47  ;;  %v54_v47 = vld [vmem:[%s3929_s3 + $0x88] sm:$0xff] }
 0x105   :  { %v3559_v61 = vpop.f32.mrf.mxu0  ;;  %1257 = vmatprep.subr.mxu1 %v3102_v0  ;;  %v3660_v57 = vand.u32 4294901760, %v54_v47 }
 0x106   :  { %1263 = vmatpush1.msra.mxu1 %v1262_v46  ;;  %v1289_v8 = vsub.f32 %v3594_v35, %v3935_v49 }
 0x107   :  { %v2929_v9 = vpop.f32.mrf.mxu0  ;;  %1264 = vmatprep.subr.mxu1 %v3102_v0  ;;  %1181 = vmatpush2.msra.mxu0 %v3660_v57 }
 0x108   :  { %v3932_v9 = vand.u32 4294901760, %v3620_v53  ;;  %1270 = vmatpush1.msra.mxu1 %v1269_v55  ;;  %v1290_v39 = vand.u32 4294901760, %v1289_v8  ;;  %v1310_v55 = vsub.f32 %v3630_v63, %v3931_v33  ;;  %1182 = vmatprep.subr.mxu0 %v3102_v0 }
 0x109   :  { %1271 = vmatprep.subr.mxu1 %v3102_v0 }
 0x10a   :  { %1277 = vmatpush1.msra.mxu1 %v1276_v3  ;;  %v1303_v46 = vsub.f32 %v3620_v53, %v3932_v9  ;;  %v53_v3 = vld [vmem:[%s3929_s3 + $0x80] sm:$0xff]  ;;  %v1311_v33 = vand.u32 4294901760, %v1310_v55  ;;  %s3105_s3 = smov 96  }
 0x10b   :  { %1278 = vmatprep.subr.mxu1 %v3102_v0 }
 0x10c   :  { %1284 = vmatpush1.msra.mxu1 %v1283_v31  ;;  %v1304_v8 = vand.u32 4294901760, %v1303_v46  ;;  %v3669_v31 = vsub.f32 %v54_v47, %v3660_v57 }
 0x10d   :  { %v3612_v45 = vpop.f32.mrf.mxu1  ;;  %1285 = vmatprep.subr.mxu1 %v3102_v0 }
 0x10e   :  { %1291 = vmatpush1.msra.mxu1 %v1290_v39  ;;  %v3934_v9 = vand.u32 4294901760, %v3669_v31 }
 0x10f   :  { %v2944_v54 = vpop.f32.mrf.mxu1  ;;  %1292 = vmatprep.subr.mxu1 %v3102_v0 }
 0x110   :  { %v1297_v54 = vand.u32 4294901760, %v1296_v32  ;;  %v3671_v32 = vand.u32 4294901760, %v53_v3  ;;  %v1345_v46 = vsub.f32 %v3669_v31, %v3934_v9 }
 0x112   :  { %v837_v10 = vpop.f32.mrf.mxu0  ;;  %1298 = vmatpush1.msra.mxu1 %v1297_v54  ;;  %v3678_v60 = vsub.f32 %v53_v3, %v3671_v32  ;;  %1184 = vmatpush2.msra.mxu0 %v3671_v32  ;;  %v1346_v54 = vand.u32 4294901760, %v1345_v46 }
 0x113   :  { %1299 = vmatprep.subr.mxu1 %v3102_v0  ;;  %1363 = vmatprep.subr.mxu0 %v3102_v0 }
 0x114   :  { %v2959_v38 = vpop.f32.mrf.mxu0  ;;  %1305 = vmatpush1.msra.mxu1 %v1304_v8  ;;  %v3938_v47 = vand.u32 4294901760, %v3678_v60 }
 0x115   :  { %1306 = vmatprep.subr.mxu1 %v3102_v0 }
 0x116   :  { %1312 = vmatpush1.msra.mxu1 %v1311_v33  ;;  %v1352_v55 = vsub.f32 %v3678_v60, %v3938_v47 }
 0x117   :  { %1341 = vmatprep.subr.mxu1 %v3102_v0 }
 0x118   :  { %1347 = vmatpush2.msra.mxu1 %v1346_v54  ;;  %v1353_v8 = vand.u32 4294901760, %v1352_v55 }
 0x119   :  { %1348 = vmatprep.subr.mxu1 %v3102_v0 }
 0x11a   :  { %1354 = vmatpush2.msra.mxu1 %v1353_v8 }
 0x11b   :  { %v916_v38 = vpop.f32.mrf.mxu1  ;;  %1473 = vmatprep.subr.mxu1 %v3102_v0 }
 0x11d   :  { %v2974_v39 = vpop.f32.mrf.mxu1 }
 0x11e   :  { %v754_v39 = vadd.f32 %v3612_v45, %v3559_v61 }
 0x120   :  { %v1005_v3 = vpop.f32.mrf.mxu0  ;;  %v838_v49 = vadd.f32 %v837_v10, %v754_v39 }
 0x122   :  { %v2989_v9 = vpop.f32.mrf.mxu0  ;;  %v917_v33 = vadd.f32 %v916_v38, %v838_v49 }
 0x124   :  { %v1006_v46 = vadd.f32 %v1005_v3, %v917_v33 }
 0x129   :  { %v1082_v40 = vpop.f32.mrf.mxu1 }
 0x12a   :  { %v1083_v34 = vadd.f32 %v1082_v40, %v1006_v46 }
 0x12b   :  { %v3004_v47 = vpop.f32.mrf.mxu1 }
 0x12c   :  { %v1086_v15 = vmul.f32 %v1083_v34, %v3515_v41  ;;  %v1088_v4 = vmul.f32 %v1083_v34, %v1083_v34 }
 0x12e   :  { %1094 = vrot.lane.b32.xlu0 %v1088_v4, %s3105_s3 }
 0x176   :  { %v1091_v54 = vpop.permute.xlu0 %1090 }
 0x177   :  { %v1097_v61 = vsel %vm56_vm1, %v1086_v15, %v1091_v54 }
 0x1a0   :  { %v1095_v45 = vpop.permute.xlu0 %1094 }
 0x1a1   :  { %v1099_v9 = vsel %vm1098_vm2, %v1097_v61, %v1095_v45  ;;  %v1101_v10 = vsel %vm1100_vm3, %v1095_v45, 0 }
 0x1a2   :  { %v3699_v55 = vand.u32 4294901760, %v1101_v10  ;;  %v3701_v49 = vand.u32 4294901760, %v1099_v9 }
 0x1a4   :  { %v1186_v40 = vsub.f32 %v1101_v10, %v3699_v55  ;;  %v3705_v38 = vsub.f32 %v1099_v9, %v3701_v49  ;;  %1356 = vmatprep.mubr.f32.mxu1 %v3699_v55  ;;  %v3108_v10 = vmov 1.0  }
 0x1a5   :  { %1358 = vmatmul.mubr.f32.vlgmr.msra.gmra.mxu1 %v3701_v49 }
 0x1a6   :  { %v1193_v41 = vand.u32 4294901760, %v3705_v38  ;;  %1475 = vmatpush1.msra.mxu1 %v3420_v62  ;;  %v1187_v4 = vand.u32 4294901760, %v1186_v40 }
 0x1a7   :  { %1476 = vmatprep.subr.mxu1 %v3102_v0 }
 0x1a8   :  { %v1194_v15 = vsub.f32 %v3705_v38, %v1193_v41  ;;  %1478 = vmatpush1.msra.mxu1 %v3431_v5  ;;  %1558 = vmatprep.mubr.f32.mxu1 %v1187_v4  ;;  %v1188_v34 = vsub.f32 %v1186_v40, %v1187_v4 }
 0x1a9   :  { %1479 = vmatprep.subr.mxu1 %v3102_v0 }
 0x1aa   :  { %1481 = vmatpush1.msra.mxu1 %v3433_v6  ;;  %v1189_v47 = vand.u32 4294901760, %v1188_v34  ;;  %v1195_v3 = vand.u32 4294901760, %v1194_v15 }
 0x1ab   :  { %1482 = vmatprep.subr.mxu1 %v3102_v0 }
 0x1ac   :  { %1484 = vmatpush1.msra.mxu1 %v3435_v7  ;;  %1190 = vmatprep.mubr.f32.mxu0 %v1189_v47 }
 0x1ad   :  { %1485 = vmatprep.subr.mxu1 %v3102_v0  ;;  %1196 = vmatmul.mubr.f32.vlgmr.msra.gmra.mxu0 %v1195_v3 }
 0x1ae   :  { %1366 = vmatpush1.msra.mxu0 %v3447_v11  ;;  %1487 = vmatpush1.msra.mxu1 %v3450_v12  ;;  %v3945_v11 = vand.u32 4294901760, %v3594_v35 }
 0x1af   :  { %1367 = vmatprep.subr.mxu0 %v3102_v0  ;;  %1465 = vmatprep.mubr.f32.mxu0 %v1186_v40 }
 0x1b0   :  { %1488 = vmatprep.subr.mxu1 %v3102_v0  ;;  %1370 = vmatpush1.msra.mxu0 %v3460_v16  ;;  %v3949_v16 = vand.u32 4294901760, %v3669_v31 }
 0x1b1   :  { %1490 = vmatpush1.msra.mxu1 %v3452_v13  ;;  %1371 = vmatprep.subr.mxu0 %v3102_v0 }
 0x1b2   :  { %1491 = vmatprep.subr.mxu1 %v3102_v0  ;;  %1374 = vmatpush1.msra.mxu0 %v3463_v17  ;;  %v3950_v17 = vand.u32 4294901760, %v3678_v60 }
 0x1b3   :  { %1493 = vmatpush1.msra.mxu1 %v3454_v14  ;;  %1375 = vmatprep.subr.mxu0 %v3102_v0 }
 0x1b4   :  { %1494 = vmatprep.subr.mxu1 %v3102_v0  ;;  %1378 = vmatpush1.msra.mxu0 %v3466_v18 }
 0x1b5   :  { %1496 = vmatpush1.msra.mxu1 %v3469_v19  ;;  %1379 = vmatprep.subr.mxu0 %v3102_v0 }
 0x1b6   :  { %1497 = vmatprep.subr.mxu1 %v3102_v0  ;;  %1382 = vmatpush1.msra.mxu0 %v3473_v22 }
 0x1b7   :  { %1499 = vmatpush1.msra.mxu1 %v3530_v50  ;;  %1383 = vmatprep.subr.mxu0 %v3102_v0 }
 0x1b8   :  { %1500 = vmatprep.subr.mxu1 %v3102_v0  ;;  %1386 = vmatpush1.msra.mxu0 %v3477_v23 }
 0x1b9   :  { %1502 = vmatpush1.msra.mxu1 %v3533_v51  ;;  %1387 = vmatprep.subr.mxu0 %v3102_v0 }
 0x1ba   :  { %1503 = vmatprep.subr.mxu1 %v3102_v0  ;;  %1390 = vmatpush1.msra.mxu0 %v3484_v27 }
 0x1bb   :  { %1505 = vmatpush1.msra.mxu1 %v3535_v52  ;;  %1391 = vmatprep.subr.mxu0 %v3102_v0 }
 0x1bc   :  { %1506 = vmatprep.subr.mxu1 %v3102_v0  ;;  %1394 = vmatpush1.msra.mxu0 %v3492_v30 }
 0x1bd   :  { %1508 = vmatpush1.msra.mxu1 %v3544_v56  ;;  %1395 = vmatprep.subr.mxu0 %v3102_v0 }
 0x1be   :  { %1509 = vmatprep.subr.mxu1 %v3102_v0  ;;  %1398 = vmatpush1.msra.mxu0 %v3551_v58 }
 0x1bf   :  { %1511 = vmatpush1.msra.mxu1 %v3565_v2  ;;  %1399 = vmatprep.subr.mxu0 %v3102_v0 }
 0x1c0   :  { %1512 = vmatprep.subr.mxu1 %v3102_v0  ;;  %1402 = vmatpush1.msra.mxu0 %v3554_v59 }
 0x1c1   :  { %1514 = vmatpush1.msra.mxu1 %v3581_v28  ;;  %1403 = vmatprep.subr.mxu0 %v3102_v0 }
 0x1c2   :  { %1515 = vmatprep.subr.mxu1 %v3102_v0  ;;  %1406 = vmatpush1.msra.mxu0 %v3563_v1 }
 0x1c3   :  { %1517 = vmatpush1.msra.mxu1 %v3596_v36  ;;  %1407 = vmatprep.subr.mxu0 %v3102_v0 }
 0x1c4   :  { %1518 = vmatprep.subr.mxu1 %v3102_v0  ;;  %1410 = vmatpush1.msra.mxu0 %v3579_v20 }
 0x1c5   :  { %1520 = vmatpush1.msra.mxu1 %v3608_v44  ;;  %1411 = vmatprep.subr.mxu0 %v3102_v0 }
 0x1c6   :  { %1549 = vmatprep.subr.mxu1 %v3102_v0  ;;  %1414 = vmatpush1.msra.mxu0 %v3594_v35 }
 0x1c7   :  { %1551 = vmatpush2.msra.mxu1 %v3660_v57  ;;  %1415 = vmatprep.subr.mxu0 %v3102_v0 }
 0x1c8   :  { %1552 = vmatprep.subr.mxu1 %v3102_v0  ;;  %1418 = vmatpush1.msra.mxu0 %v3606_v42 }
 0x1c9   :  { %1554 = vmatpush2.msra.mxu1 %v3671_v32  ;;  %1419 = vmatprep.subr.mxu0 %v3102_v0 }
 0x1ca   :  { %1562 = vmatmul.mubr.f32.vlgmr.msra.gmra.mxu1 %v1193_v41  ;;  %1693 = vmatprep.subr.mxu1 %v3102_v0 }
 0x1cb   :  { %1422 = vmatpush1.msra.mxu0 %v3620_v53  ;;  %1695 = vmatpush1.msra.mxu1 %v3420_v62  ;;  %v3941_v62 = vand.u32 4294901760, %v3551_v58 }
 0x1cc   :  { %1776 = vmatprep.mubr.f32.mxu1 %v3699_v55  ;;  %1423 = vmatprep.subr.mxu0 %v3102_v0 }
 0x1cd   :  { %1696 = vmatprep.subr.mxu1 %v3102_v0  ;;  %1426 = vmatpush1.msra.mxu0 %v3630_v63 }
 0x1ce   :  { %1698 = vmatpush1.msra.mxu1 %v3431_v5  ;;  %1455 = vmatprep.subr.mxu0 %v3102_v0  ;;  %v3942_v5 = vand.u32 4294901760, %v3554_v59 }
 0x1cf   :  { %1699 = vmatprep.subr.mxu1 %v3102_v0  ;;  %1458 = vmatpush2.msra.mxu0 %v3669_v31 }
 0x1d0   :  { %1701 = vmatpush1.msra.mxu1 %v3433_v6  ;;  %1459 = vmatprep.subr.mxu0 %v3102_v0  ;;  %v3943_v6 = vand.u32 4294901760, %v3563_v1 }
 0x1d1   :  { %1702 = vmatprep.subr.mxu1 %v3102_v0  ;;  %1462 = vmatpush2.msra.mxu0 %v3678_v60 }
 0x1d2   :  { %1704 = vmatpush1.msra.mxu1 %v3435_v7  ;;  %1468 = vmatmul.mubr.f32.vlgmr.msra.gmra.mxu0 %v3705_v38  ;;  %v3944_v7 = vand.u32 4294901760, %v3579_v20 }
 0x1d3   :  { %1567 = vmatprep.subr.mxu0 %v3102_v0  ;;  %1705 = vmatprep.subr.mxu1 %v3102_v0 }
 0x1d4   :  { %1571 = vmatpush1.msra.mxu0 %v1204_v21  ;;  %1686 = vmatprep.mubr.f32.mxu0 %v3699_v55 }
 0x1d5   :  { %1707 = vmatpush1.msra.mxu1 %v3450_v12  ;;  %1572 = vmatprep.subr.mxu0 %v3102_v0  ;;  %v3946_v12 = vand.u32 4294901760, %v3606_v42 }
 0x1d6   :  { %1708 = vmatprep.subr.mxu1 %v3102_v0  ;;  %1576 = vmatpush1.msra.mxu0 %v1211_v24 }
 0x1d7   :  { %1710 = vmatpush1.msra.mxu1 %v3452_v13  ;;  %1577 = vmatprep.subr.mxu0 %v3102_v0  ;;  %v3947_v13 = vand.u32 4294901760, %v3620_v53 }
 0x1d8   :  { %1711 = vmatprep.subr.mxu1 %v3102_v0  ;;  %1581 = vmatpush1.msra.mxu0 %v1218_v25 }
 0x1d9   :  { %1713 = vmatpush1.msra.mxu1 %v3454_v14  ;;  %1582 = vmatprep.subr.mxu0 %v3102_v0  ;;  %v3948_v14 = vand.u32 4294901760, %v3630_v63 }
 0x1da   :  { %1714 = vmatprep.subr.mxu1 %v3102_v0  ;;  %1586 = vmatpush1.msra.mxu0 %v1225_v26 }
 0x1db   :  { %1716 = vmatpush1.msra.mxu1 %v3469_v19  ;;  %1587 = vmatprep.subr.mxu0 %v3102_v0 }
 0x1dc   :  { %1717 = vmatprep.subr.mxu1 %v3102_v0  ;;  %1591 = vmatpush1.msra.mxu0 %v1232_v29 }
 0x1dd   :  { %1719 = vmatpush1.msra.mxu1 %v3530_v50  ;;  %1592 = vmatprep.subr.mxu0 %v3102_v0 }
 0x1de   :  { %1720 = vmatprep.subr.mxu1 %v3102_v0  ;;  %1596 = vmatpush1.msra.mxu0 %v1239_v37 }
 0x1df   :  { %1722 = vmatpush1.msra.mxu1 %v3533_v51  ;;  %1597 = vmatprep.subr.mxu0 %v3102_v0 }
 0x1e0   :  { %1723 = vmatprep.subr.mxu1 %v3102_v0  ;;  %1601 = vmatpush1.msra.mxu0 %v1246_v43 }
 0x1e1   :  { %1725 = vmatpush1.msra.mxu1 %v3535_v52  ;;  %1602 = vmatprep.subr.mxu0 %v3102_v0 }
 0x1e2   :  { %1726 = vmatprep.subr.mxu1 %v3102_v0  ;;  %1606 = vmatpush1.msra.mxu0 %v1253_v48 }
 0x1e3   :  { %1728 = vmatpush1.msra.mxu1 %v3544_v56  ;;  %1607 = vmatprep.subr.mxu0 %v3102_v0 }
 0x1e4   :  { %1729 = vmatprep.subr.mxu1 %v3102_v0  ;;  %1611 = vmatpush1.msra.mxu0 %v3941_v62 }
 0x1e5   :  { %1731 = vmatpush1.msra.mxu1 %v3565_v2  ;;  %1612 = vmatprep.subr.mxu0 %v3102_v0 }
 0x1e6   :  { %1732 = vmatprep.subr.mxu1 %v3102_v0  ;;  %1616 = vmatpush1.msra.mxu0 %v3942_v5 }
 0x1e7   :  { %1734 = vmatpush1.msra.mxu1 %v3581_v28  ;;  %1617 = vmatprep.subr.mxu0 %v3102_v0 }
 0x1e8   :  { %1735 = vmatprep.subr.mxu1 %v3102_v0  ;;  %1621 = vmatpush1.msra.mxu0 %v3943_v6 }
 0x1e9   :  { %1737 = vmatpush1.msra.mxu1 %v3596_v36  ;;  %1622 = vmatprep.subr.mxu0 %v3102_v0  ;;  %v3107_v36 = vmov 0  }
 0x1ea   :  { %1738 = vmatprep.subr.mxu1 %v3102_v0  ;;  %1626 = vmatpush1.msra.mxu0 %v3944_v7  ;;  %v1801_v42 = vsel %vm1799_vm4, 1.0, %v3107_v36 }
 0x1eb   :  { %1740 = vmatpush1.msra.mxu1 %v3608_v44  ;;  %1627 = vmatprep.subr.mxu0 %v3102_v0  ;;  %v1870_v44 = vsub.f32 %v1801_v42, %v1801_v42 }
 0x1ec   :  { %1769 = vmatprep.subr.mxu1 %v3102_v0  ;;  %1631 = vmatpush1.msra.mxu0 %v3945_v11 }
 0x1ed   :  { %1771 = vmatpush2.msra.mxu1 %v3660_v57  ;;  %1632 = vmatprep.subr.mxu0 %v3102_v0  ;;  %v1871_v53 = vand.u32 4294901760, %v1870_v44 }
 0x1ee   :  { %1772 = vmatprep.subr.mxu1 %v3102_v0  ;;  %1636 = vmatpush1.msra.mxu0 %v3946_v12 }
 0x1ef   :  { %1774 = vmatpush2.msra.mxu1 %v3671_v32  ;;  %1637 = vmatprep.subr.mxu0 %v3102_v0  ;;  %v1872_v60 = vsub.f32 %v1870_v44, %v1871_v53 }
 0x1f0   :  { %1778 = vmatmul.mubr.f32.vlgmr.msra.gmra.mxu1 %v3701_v49  ;;  %1641 = vmatpush1.msra.mxu0 %v3947_v13 }
 0x1f1   :  { %1642 = vmatprep.subr.mxu0 %v3102_v0  ;;  %3010 = vmatprep.subr.mxu1 %v3102_v0  ;;  %v1873_v31 = vand.u32 4294901760, %v1872_v60 }
 0x1f2   :  { %1646 = vmatpush1.msra.mxu0 %v3948_v14  ;;  %3012 = vmatprep.mubr.msk.f32.mxu1 %vm3103_vm0, %v3102_v0 }
 0x1f3   :  { %1675 = vmatprep.subr.mxu0 %v3102_v0 }
 0x1f4   :  { %1679 = vmatpush2.msra.mxu0 %v3949_v16 }
 0x1f5   :  { %1680 = vmatprep.subr.mxu0 %v3102_v0 }
 0x1f6   :  { %1684 = vmatpush2.msra.mxu0 %v3950_v17 }
 0x1f7   :  { %1688 = vmatmul.mubr.f32.vlgmr.msra.gmra.mxu0 %v3701_v49  ;;  %3005 = vmatprep.subr.mxu0 %v3102_v0 }
 0x1f8   :  { %3007 = vmatprep.mubr.msk.f32.mxu0 %vm3103_vm0, %v3102_v0 }
 0x265   :  { %v1359_v18 = vpop.f32.mrf.mxu1 }
 0x267   :  { %v1361_v19 = vpop.f32.mrf.mxu1 }
 0x26d   :  { %v1197_v21 = vpop.f32.mrf.mxu0 }
 0x26e   :  { %v1360_v22 = vadd.f32 %v1359_v18, %v1197_v21 }
 0x26f   :  { %v1199_v23 = vpop.f32.mrf.mxu0 }
 0x28a   :  { %v1563_v24 = vpop.f32.mrf.mxu1 }
 0x28c   :  { %v1565_v25 = vpop.f32.mrf.mxu1 }
 0x292   :  { %v1469_v26 = vpop.f32.mrf.mxu0 }
 0x293   :  { %v1470_v30 = vadd.f32 %v1469_v26, %v1360_v22 }
 0x294   :  { %v1471_v27 = vpop.f32.mrf.mxu0 }
 0x295   :  { %v1564_v43 = vadd.f32 %v1563_v24, %v1470_v30 }
 0x2b0   :  { %v1779_v29 = vpop.f32.mrf.mxu1 }
 0x2b2   :  { %v1781_v37 = vpop.f32.mrf.mxu1 }
 0x2b7   :  { %v1689_v48 = vpop.f32.mrf.mxu0 }
 0x2b8   :  { %v1690_v50 = vadd.f32 %v1689_v48, %v1564_v43 }
 0x2b9   :  { %v1691_v51 = vpop.f32.mrf.mxu0 }
 0x2ba   :  { %v1780_v52 = vadd.f32 %v1779_v29, %v1690_v50 }
 0x2bc   :  { %1784 = vrot.lane.b32.xlu1 %v1780_v52, %s3106_s5 }
 0x32e   :  { %v1785_v56 = vpop.permute.xlu1 %1784 }
 0x32f   :  { %v1787_v58 = vmul.f32 %v1785_v56, %v1780_v52  ;;  %v1795_v20 = vadd.f32 %v1785_v56, %v1780_v52 }
 0x331   :  { %v1788_v59 = vmax.f32 %v1787_v58, 1e-16 }
 0x333   :  { %3075 = vrsqrt.f32 %v1788_v59 }
 0x340   :  { %v3076_v1 = vpop.eup %3075 }
 0x341   :  { %v1796_v2 = vmul.f32 %v3076_v1, %v1787_v58  ;;  %1791 = vrot.lane.b32.xlu1 %v3076_v1, %s3106_s5 }
 0x343   :  { %v1797_v28 = vmul.f32 2.0, %v1796_v2 }
 0x345   :  { %v1798_v35 = vsub.f32 %v1795_v20, %v1797_v28 }
 0x347   :  { %2250 = vrot.lane.b32.xlu0 %v1798_v35, %s3106_s5 }
 0x3b3   :  { %v1792_v63 = vpop.permute.xlu1 %1791 }
 0x3b4   :  { %v1794_v57 = vmul.f32 %v1792_v63, %v1780_v52 }
 0x3b6   :  { %v1834_v32 = vand.u32 4294901760, %v1794_v57 }
 0x3b8   :  { %v1911_v8 = vsub.f32 %v1794_v57, %v1834_v32  ;;  %3006 = vmatpush3.msra.mxu0 %v1834_v32 }
 0x3b9   :  { %3008 = vmatmul.mubr.f32.vlgmr.msra.gmra.mxu0 %v1873_v31  ;;  %3015 = vmatprep.subr.mxu0 %v3102_v0  ;;  %v2251_v39 = vpop.permute.xlu0 %2250 }
 0x3ba   :  { %v1912_v33 = vand.u32 4294901760, %v1911_v8  ;;  %v2284_v46 = vand.u32 4294901760, %v2251_v39  ;;  %3016 = vmatpush3.msra.mxu0 %v1911_v8  ;;  %3017 = vmatprep.mubr.msk.f32.mxu0 %vm3103_vm0, %v3102_v0 }
 0x3bb   :  { %3025 = vmatprep.subr.mxu0 %v3102_v0 }
 0x3bc   :  { %v1913_v54 = vsub.f32 %v1911_v8, %v1912_v33  ;;  %v2361_v61 = vsub.f32 %v2251_v39, %v2284_v46 }
 0x3bd   :  { %3018 = vmatmul.mubr.f32.vlgmr.msra.gmra.mxu0 %v1870_v44 }
 0x3be   :  { %3026 = vmatpush3.msra.mxu0 %v1912_v33  ;;  %v1914_v45 = vand.u32 4294901760, %v1913_v54  ;;  %3027 = vmatprep.mubr.msk.f32.mxu0 %vm3103_vm0, %v3102_v0  ;;  %v2362_v9 = vand.u32 4294901760, %v2361_v61 }
 0x3bf   :  { %3035 = vmatprep.subr.mxu0 %v3102_v0 }
 0x3c0   :  { %3011 = vmatpush3.msra.mxu1 %v1914_v45  ;;  %v2363_v55 = vsub.f32 %v2361_v61, %v2362_v9 }
 0x3c1   :  { %3013 = vmatmul.mubr.msk.f32.vlgmr.msra.gmra.mxu1 %vm1799_vm4, %v3108_v10  ;;  %3020 = vmatprep.subr.mxu1 %v3102_v0 }
 0x3c2   :  { %3028 = vmatmul.mubr.msk.f32.vlgmr.msra.gmra.mxu0 %vm1799_vm4, %v3108_v10  ;;  %3021 = vmatpush3.msra.mxu1 %v1834_v32  ;;  %v2364_v49 = vand.u32 4294901760, %v2363_v55 }
 0x3c3   :  { %3036 = vmatpush3.msra.mxu0 %v2284_v46  ;;  %3022 = vmatprep.mubr.msk.f32.mxu1 %vm3103_vm0, %v3102_v0 }
 0x3c4   :  { %3030 = vmatprep.subr.mxu1 %v3102_v0  ;;  %3037 = vmatprep.mubr.msk.f32.mxu0 %vm3103_vm0, %v3102_v0 }
 0x3c5   :  { %3045 = vmatprep.subr.mxu0 %v3102_v0  ;;  %3023 = vmatmul.mubr.f32.vlgmr.msra.gmra.mxu1 %v1871_v53 }
 0x3c6   :  { %3031 = vmatpush3.msra.mxu1 %v1834_v32  ;;  %3038 = vmatmul.mubr.f32.vlgmr.msra.gmra.mxu0 %v1873_v31 }
 0x3c7   :  { %3046 = vmatpush3.msra.mxu0 %v2361_v61  ;;  %3032 = vmatprep.mubr.msk.f32.mxu1 %vm3103_vm0, %v3102_v0 }
 0x3c8   :  { %3040 = vmatprep.subr.mxu1 %v3102_v0  ;;  %3047 = vmatprep.mubr.msk.f32.mxu0 %vm3103_vm0, %v3102_v0 }
 0x3c9   :  { %3055 = vmatprep.subr.mxu0 %v3102_v0  ;;  %3033 = vmatmul.mubr.msk.f32.vlgmr.msra.gmra.mxu1 %vm1799_vm4, %v3108_v10 }
 0x3ca   :  { %3041 = vmatpush3.msra.mxu1 %v2364_v49  ;;  %3048 = vmatmul.mubr.f32.vlgmr.msra.gmra.mxu0 %v1870_v44 }
 0x3cb   :  { %3056 = vmatpush3.msra.mxu0 %v2362_v9  ;;  %3042 = vmatprep.mubr.msk.f32.mxu1 %vm3103_vm0, %v3102_v0 }
 0x3cc   :  { %3050 = vmatprep.subr.mxu1 %v3102_v0  ;;  %3057 = vmatprep.mubr.msk.f32.mxu0 %vm3103_vm0, %v3102_v0 }
 0x3cd   :  { %3043 = vmatmul.mubr.msk.f32.vlgmr.msra.gmra.mxu1 %vm1799_vm4, %v3108_v10 }
 0x3ce   :  { %3051 = vmatpush3.msra.mxu1 %v2284_v46  ;;  %3052 = vmatprep.mubr.msk.f32.mxu1 %vm3103_vm0, %v3102_v0 }
 0x3cf   :  { %3060 = vmatprep.subr.mxu1 %v3102_v0  ;;  %3058 = vmatmul.mubr.msk.f32.vlgmr.msra.gmra.mxu0 %vm1799_vm4, %v3108_v10 }
 0x3d1   :  { %3053 = vmatmul.mubr.f32.vlgmr.msra.gmra.mxu1 %v1871_v53 }
 0x3d2   :  { %3061 = vmatpush3.msra.mxu1 %v2284_v46  ;;  %3062 = vmatprep.mubr.msk.f32.mxu1 %vm3103_vm0, %v3102_v0 }
 0x3d5   :  { %3063 = vmatmul.mubr.msk.f32.vlgmr.msra.gmra.mxu1 %vm1799_vm4, %v3108_v10 }
 0x479   :  { %v1875_v40 = vpop.f32.mrf.mxu0 }
 0x47b   :  { %v3009_v38 = vpop.f32.mrf.mxu0 }
 0x47d   :  { %v2025_v41 = vpop.f32.mrf.mxu0 }
 0x47f   :  { %v3019_v4 = vpop.f32.mrf.mxu0 }
 0x481   :  { %v1951_v15 = vpop.f32.mrf.mxu1 }
 0x482   :  { %v2173_v34 = vpop.f32.mrf.mxu0  ;;  %v1952_v7 = vadd.f32 %v1951_v15, %v1875_v40 }
 0x483   :  { %v3014_v47 = vpop.f32.mrf.mxu1 }
 0x484   :  { %v3029_v3 = vpop.f32.mrf.mxu0  ;;  %v2026_v16 = vadd.f32 %v2025_v41, %v1952_v7 }
 0x485   :  { %v2099_v62 = vpop.f32.mrf.mxu1 }
 0x486   :  { %v2325_v5 = vpop.f32.mrf.mxu0  ;;  %v2100_v22 = vadd.f32 %v2099_v62, %v2026_v16 }
 0x487   :  { %v3024_v6 = vpop.f32.mrf.mxu1 }
 0x488   :  { %v3039_v11 = vpop.f32.mrf.mxu0  ;;  %v2174_v29 = vadd.f32 %v2173_v34, %v2100_v22 }
 0x489   :  { %v2245_v12 = vpop.f32.mrf.mxu1 }
 0x48a   :  { %v2475_v13 = vpop.f32.mrf.mxu0  ;;  %v2246_v50 = vadd.f32 %v2245_v12, %v2174_v29 }
 0x48b   :  { %v3034_v14 = vpop.f32.mrf.mxu1 }
 0x48c   :  { %v3049_v0 = vpop.f32.mrf.mxu0 }
 0x48d   :  { %v2401_v17 = vpop.f32.mrf.mxu1 }
 0x48e   :  { %v2402_v18 = vadd.f32 %v2401_v17, %v2325_v5 }
 0x48f   :  { %v3044_v19 = vpop.f32.mrf.mxu1  ;;  %v2623_v21 = vpop.f32.mrf.mxu0 }
 0x490   :  { %v2476_v23 = vadd.f32 %v2475_v13, %v2402_v18 }
 0x491   :  { %v2549_v24 = vpop.f32.mrf.mxu1  ;;  %v3059_v25 = vpop.f32.mrf.mxu0 }
 0x492   :  { %v2550_v26 = vadd.f32 %v2549_v24, %v2476_v23 }
 0x493   :  { %v3054_v27 = vpop.f32.mrf.mxu1 }
 0x494   :  { %v2624_v30 = vadd.f32 %v2623_v21, %v2550_v26 }
 0x495   :  { %v2695_v37 = vpop.f32.mrf.mxu1 }
 0x496   :  { %v2696_v43 = vadd.f32 %v2695_v37, %v2624_v30 }
 0x497   :  { %v3064_v48 = vpop.f32.mrf.mxu1 }
 0x498   :  { %v2700_v51 = vrot.slane %v2696_v43, 7 }
 0x49a   :  { %v2703_v52 = vsel %vm2702_vm5, %v2246_v50, %v2700_v51 }
 0x49b   :  { %2705 = vst.msk [vmem:[%s3930_s4] sm:$0x3] %vm2704_vm6, %v2703_v52 }
 0x49c   :  { %2710 = vsyncpa [#allocation3], 1 }

</bundles_post_ra>
